<compile_context>
chip_gen: v5e
topology: v5e:2x2
jax: 0.10.0
libtpu: 0.0.40
codegen_flags: <defaults>
</compile_context>

<pallas_src>
import jax
import jax.numpy as jnp
from jax.experimental import pallas as pl
from jax.experimental.pallas import tpu as pltpu


def _round_up(x, m):
    return (x + m - 1) // m * m


def _mlp_kernel(x_ref, w1_ref, b1_ref, w2_ref, b2_ref, o_ref):
    # x_ref : (TB, dim_in)        VMEM (pipelined per grid step)
    # w1_ref: (dim_in, hidden)    VMEM (resident across grid)
    # b1_ref: (1, hidden)         VMEM (resident, f32)
    # w2_ref: (hidden, dout_pad)  VMEM (resident)
    # b2_ref: (1, dout_pad)       VMEM (resident, f32)
    # o_ref : (TB, dout_pad)      VMEM (pipelined per grid step)
    #
    # bf16 operands for the MXU (2x rate on v6e/v7x), f32 accumulation.
    x = x_ref[...].astype(jnp.bfloat16)
    w1 = w1_ref[...].astype(jnp.bfloat16)
    h = jnp.dot(x, w1, preferred_element_type=jnp.float32)
    # Bias-add + ReLU in f32 on the VPU (v5e has no bf16 VPU).
    h = jnp.maximum(h + b1_ref[...], 0.0)

    w2 = w2_ref[...].astype(jnp.bfloat16)
    y = jnp.dot(h.astype(jnp.bfloat16), w2, preferred_element_type=jnp.float32)
    y = y + b2_ref[...]
    o_ref[...] = y.astype(o_ref.dtype)


def naive_mlp_forward(x, w1, b1, w2, b2, *, tile_b=256):
    """Fused MLP forward.  x: (B, ...) flattened to (B, dim_in)."""
    B = x.shape[0]
    x2d = x.reshape(B, -1)                  # same as torch x.view(B, -1)
    dim_in = x2d.shape[1]
    hidden = w1.shape[1]
    dim_out = w2.shape[1]

    # --- Batch tiling: sublane-aligned tile, pad B up to a tile multiple. ---
    TB = min(tile_b, _round_up(B, 8))
    B_pad = _round_up(B, TB)
    if B_pad != B:
        x2d = jnp.pad(x2d, ((0, B_pad - B), (0, 0)))

    # --- Lane-dense output: pad dim_out to a multiple of 128 with zeros. ---
    dout_pad = _round_up(dim_out, 128)
    if dout_pad != dim_out:
        w2 = jnp.pad(w2, ((0, 0), (0, dout_pad - dim_out)))
        b2 = jnp.pad(b2, (0, dout_pad - dim_out))

    # Biases as (1, N) 2-D arrays for TPU lane layout, kept in f32.
    b1_2d = b1.reshape(1, hidden).astype(jnp.float32)
    b2_2d = b2.reshape(1, dout_pad).astype(jnp.float32)

    grid = (B_pad // TB,)

    cost = pl.CostEstimate(
        flops=2 * B_pad * (dim_in * hidden + hidden * dout_pad),
        transcendentals=0,
        bytes_accessed=(x2d.size * x2d.dtype.itemsize
                        + w1.size * w1.dtype.itemsize
                        + w2.size * w2.dtype.itemsize
                        + b1_2d.size * 4 + b2_2d.size * 4
                        + B_pad * dout_pad * x.dtype.itemsize),
    )

    out = pl.pallas_call(
        _mlp_kernel,
        out_shape=jax.ShapeDtypeStruct((B_pad, dout_pad), x.dtype),
        grid_spec=pltpu.PrefetchScalarGridSpec(
            num_scalar_prefetch=0,
            grid=grid,
            in_specs=[
                # x: one batch tile per grid step (double-buffered DMA).
                pl.BlockSpec((TB, dim_in), lambda i: (i, 0)),
                # Weights / biases: constant index map -> resident in VMEM,
                # not re-DMA'd per step.
                pl.BlockSpec((dim_in, hidden), lambda i: (0, 0)),
                pl.BlockSpec((1, hidden), lambda i: (0, 0)),
                pl.BlockSpec((hidden, dout_pad), lambda i: (0, 0)),
                pl.BlockSpec((1, dout_pad), lambda i: (0, 0)),
            ],
            out_specs=pl.BlockSpec((TB, dout_pad), lambda i: (i, 0)),
        ),
        compiler_params=pltpu.CompilerParams(
            # Batch tiles are independent -> shard across v7x's 2 TCs.
            dimension_semantics=("parallel",)),
        cost_estimate=cost,
    )(x2d, w1, b1_2d, w2, b2_2d)

    # Slice off batch padding and output-lane padding.
    return out[:B, :dim_out]


def init_params(key, dim_in, dim_out, dim_hidden=128, dtype=jnp.float32):
    """Deterministic init mirroring nn.Linear's uniform(-1/sqrt(fan_in), +)."""
    k1, k2, k3, k4 = jax.random.split(key, 4)
    lim1 = 1.0 / jnp.sqrt(jnp.float32(dim_in))
    lim2 = 1.0 / jnp.sqrt(jnp.float32(dim_hidden))
    # Stored as (in, out) so kernel does x @ W (== x @ W_pt.T).
    w1 = jax.random.uniform(k1, (dim_in, dim_hidden), dtype, -lim1, lim1)
    b1 = jax.random.uniform(k2, (dim_hidden,), dtype, -lim1, lim1)
    w2 = jax.random.uniform(k3, (dim_hidden, dim_out), dtype, -lim2, lim2)
    b2 = jax.random.uniform(k4, (dim_out,), dtype, -lim2, lim2)
    return w1, b1, w2, b2


if __name__ == "__main__":
    key = jax.random.PRNGKey(0)
    kx, kp = jax.random.split(key)

    # Small shapes consistent with the module: x is (B, C, H, W) -> flattened.
    B, C, H, W = 2, 4, 16, 16
    dim_in = C * H * W          # 1024
    dim_hidden = 128
    dim_out = 16

    x = jax.random.normal(kx, (B, C, H, W), jnp.float32)
    w1, b1, w2, b2 = init_params(kp, dim_in, dim_out, dim_hidden)

    out = naive_mlp_forward(x, w1, b1, w2, b2)
    out = jax.block_until_ready(out)
    assert out.shape == (B, dim_out)

    # Pure-JAX reference mimicking the kernel's bf16-operand / f32-accumulate
    # matmuls (tight tolerance), plus a loose check vs. the full-f32 math.
    x2d = x.reshape(B, -1)
    h_ref = jnp.dot(x2d.astype(jnp.bfloat16), w1.astype(jnp.bfloat16),
                    preferred_element_type=jnp.float32) + b1
    h_ref = jnp.maximum(h_ref, 0.0)
    ref_bf16 = jnp.dot(h_ref.astype(jnp.bfloat16), w2.astype(jnp.bfloat16),
                       preferred_element_type=jnp.float32) + b2
    assert jnp.allclose(out, ref_bf16, atol=1e-3, rtol=1e-3)

    ref_f32 = jnp.maximum(x2d @ w1 + b1, 0.0) @ w2 + b2
    assert jnp.allclose(out, ref_f32, atol=5e-2, rtol=5e-2)

    print("KERNEL_OK")
</pallas_src>

<mosaic_0001>
module attributes {stable_mosaic.version = 11 : i64} {
  func.func @_mlp_kernel(%arg0: i32, %arg1: memref<8x1024xf32, #tpu.memory_space<vmem>>, %arg2: memref<1024x128xf32, #tpu.memory_space<vmem>>, %arg3: memref<1x128xf32, #tpu.memory_space<vmem>>, %arg4: memref<128x128xf32, #tpu.memory_space<vmem>>, %arg5: memref<1x128xf32, #tpu.memory_space<vmem>>, %arg6: memref<8x128xf32, #tpu.memory_space<vmem>>) attributes {dimension_semantics = [#tpu.dimension_semantics<parallel>], iteration_bounds = array<i64: 1>, scalar_prefetch = 0 : i64, scratch_operands = 0 : i64, tpu.core_type = #tpu.core_type<tc>, window_params = [{transform_indices = @transform_0, window_bounds = array<i64: 8, 1024>}, {pipeline_mode = #tpu.pipeline_mode<synchronous>, transform_indices = @transform_1, window_bounds = array<i64: 1024, 128>}, {pipeline_mode = #tpu.pipeline_mode<synchronous>, transform_indices = @transform_2, window_bounds = array<i64: 1, 128>}, {pipeline_mode = #tpu.pipeline_mode<synchronous>, transform_indices = @transform_3, window_bounds = array<i64: 128, 128>}, {pipeline_mode = #tpu.pipeline_mode<synchronous>, transform_indices = @transform_4, window_bounds = array<i64: 1, 128>}, {transform_indices = @transform_5, window_bounds = array<i64: 8, 128>}]} {
    %c0 = arith.constant 0 : index
    %c0_0 = arith.constant 0 : index
    %0 = vector.load %arg1[%c0, %c0_0] : memref<8x1024xf32, #tpu.memory_space<vmem>>, vector<8x1024xf32>
    %1 = arith.truncf %0 : vector<8x1024xf32> to vector<8x1024xbf16>
    %c0_1 = arith.constant 0 : index
    %c0_2 = arith.constant 0 : index
    %2 = vector.load %arg2[%c0_1, %c0_2] : memref<1024x128xf32, #tpu.memory_space<vmem>>, vector<1024x128xf32>
    %3 = arith.truncf %2 : vector<1024x128xf32> to vector<1024x128xbf16>
    %cst = arith.constant dense<0.000000e+00> : vector<8x128xf32>
    %4 = tpu.matmul %1, %3, %cst {dimension_numbers = #tpu.dot_dimension_numbers<[1], [0], [0], [1], [0, 0, 1, 1], [], []>} : vector<8x1024xbf16>, vector<1024x128xbf16>, vector<8x128xf32> -> vector<8x128xf32>
    %c0_3 = arith.constant 0 : index
    %c0_4 = arith.constant 0 : index
    %5 = vector.load %arg3[%c0_3, %c0_4] : memref<1x128xf32, #tpu.memory_space<vmem>>, vector<1x128xf32>
    %6 = vector.broadcast %5 : vector<1x128xf32> to vector<8x128xf32>
    %7 = arith.addf %4, %6 : vector<8x128xf32>
    %cst_5 = arith.constant 0.000000e+00 : f32
    %8 = vector.broadcast %cst_5 : f32 to vector<8x128xf32>
    %9 = arith.maximumf %7, %8 : vector<8x128xf32>
    %c0_6 = arith.constant 0 : index
    %c0_7 = arith.constant 0 : index
    %10 = vector.load %arg4[%c0_6, %c0_7] : memref<128x128xf32, #tpu.memory_space<vmem>>, vector<128x128xf32>
    %11 = arith.truncf %10 : vector<128x128xf32> to vector<128x128xbf16>
    %12 = arith.truncf %9 : vector<8x128xf32> to vector<8x128xbf16>
    %cst_8 = arith.constant dense<0.000000e+00> : vector<8x128xf32>
    %13 = tpu.matmul %12, %11, %cst_8 {dimension_numbers = #tpu.dot_dimension_numbers<[1], [0], [0], [1], [0, 0, 1, 1], [], []>} : vector<8x128xbf16>, vector<128x128xbf16>, vector<8x128xf32> -> vector<8x128xf32>
    %c0_9 = arith.constant 0 : index
    %c0_10 = arith.constant 0 : index
    %14 = vector.load %arg5[%c0_9, %c0_10] : memref<1x128xf32, #tpu.memory_space<vmem>>, vector<1x128xf32>
    %15 = vector.broadcast %14 : vector<1x128xf32> to vector<8x128xf32>
    %16 = arith.addf %13, %15 : vector<8x128xf32>
    %c0_11 = arith.constant 0 : index
    %c0_12 = arith.constant 0 : index
    %17 = vector.load %arg6[%c0_11, %c0_12] : memref<8x128xf32, #tpu.memory_space<vmem>>, vector<8x128xf32>
    tpu.vector_store %arg6[%c0_11, %c0_12], %16 {strides = array<i32>} : memref<8x128xf32, #tpu.memory_space<vmem>>, vector<8x128xf32>,
    return
  }
  func.func @transform_0(%arg0: i32) -> (i32, i32) {
    %c0_i32 = arith.constant 0 : i32
    %c0_i32_0 = arith.constant 0 : i32
    return %arg0, %c0_i32 : i32, i32
  }
  func.func @transform_1(%arg0: i32) -> (i32, i32) {
    %c0_i32 = arith.constant 0 : i32
    %c0_i32_0 = arith.constant 0 : i32
    %c0_i32_1 = arith.constant 0 : i32
    return %c0_i32, %c0_i32_0 : i32, i32
  }
  func.func @transform_2(%arg0: i32) -> (i32, i32) {
    %c0_i32 = arith.constant 0 : i32
    %c0_i32_0 = arith.constant 0 : i32
    %c0_i32_1 = arith.constant 0 : i32
    return %c0_i32, %c0_i32_0 : i32, i32
  }
  func.func @transform_3(%arg0: i32) -> (i32, i32) {
    %c0_i32 = arith.constant 0 : i32
    %c0_i32_0 = arith.constant 0 : i32
    %c0_i32_1 = arith.constant 0 : i32
    return %c0_i32, %c0_i32_0 : i32, i32
  }
  func.func @transform_4(%arg0: i32) -> (i32, i32) {
    %c0_i32 = arith.constant 0 : i32
    %c0_i32_0 = arith.constant 0 : i32
    %c0_i32_1 = arith.constant 0 : i32
    return %c0_i32, %c0_i32_0 : i32, i32
  }
  func.func @transform_5(%arg0: i32) -> (i32, i32) {
    %c0_i32 = arith.constant 0 : i32
    %c0_i32_0 = arith.constant 0 : i32
    return %arg0, %c0_i32 : i32, i32
  }
}

</mosaic_0001>

<bundles_post_ra>
// kernel: tpu_custom_call.1
= control target key start
LH: loop header
LB: loop body
LE: loop exit
PB: predicated region body
PF: predicated region fallthrough
CT: control target
= control target key end

     0   :  { %10 = vsyncpa [#allocation3], 0  ;;  %s608_s0 = inlined_call_operand.hbm [shape: f32[8,1024], index: 0, kind: input, shape index: {}]   ;;  %s609_s1 = inlined_call_operand.hbm [shape: f32[1024,128], index: 1, kind: input, shape index: {}]   ;;  %s610_s2 = inlined_call_operand.vmem [shape: f32[1,128], index: 2, kind: input, shape index: {}]   ;;  %s611_s3 = inlined_call_operand.hbm [shape: f32[128,128], index: 3, kind: input, shape index: {}]   ;;  %s612_s4 = inlined_call_operand.vmem [shape: f32[1,128], index: 4, kind: input, shape index: {}]   ;;  %s613_s5 = inlined_call_operand.hbm [shape: f32[8,128], index: 5, kind: output, shape index: {}]  }
   0x1   :  { %11 = vsyncpa [#allocation6], 0  ;;  %s28_s20 = sshll.u32 %s609_s1, 4  ;;  %s29_s20 = int_to_ptr.hbm [resolvable:$true] %s28_s20 }
   0x2   :  { %12 = vsyncpa [#allocation4], 0  ;;  %s554_s21 = smov [#allocation5]   ;;  %s18_s25 = sshll.u32 %s608_s0, 4  ;;  %s19_s25 = int_to_ptr.hbm [resolvable:$true] %s18_s25 }
   0x3   :  { %s30_s22 = sshll.u32 %s554_s21, 4  ;;  %s555_s26 = smov 128   ;;  %s31_s22 = int_to_ptr.vmem [resolvable:$true] %s30_s22 }
   0x4   :  { %s556_s27 = smov 8   ;;  %s557_s28 = smov [#allocation2]  }
   0x5   :  { %36 = dma.hbm_to_vmem [thread:$0]  %s29_s20, 16384, %s31_s22, [#allocation6], %s555_s26, %s555_s26, %s556_s27  }
   0x6   :  { %s20_s29 = sshll.u32 %s557_s28, 4  ;;  %s43_s7 = sshll.u32 %s611_s3, 4  ;;  %s21_s29 = int_to_ptr.vmem [resolvable:$true] %s20_s29  ;;  %s44_s7 = int_to_ptr.hbm [resolvable:$true] %s43_s7 }
   0x7   :  { %23 = dma.hbm_to_vmem [thread:$0]  %s19_s25, 1024, %s21_s29, [#allocation3]  }
   0x8   :  { %s558_s1 = smov [#allocation7]  }
   0x9   :  { %s45_s8 = sshll.u32 %s558_s1, 4  ;;  %s46_s8 = int_to_ptr.vmem [resolvable:$true] %s45_s8 }
   0xa   :  { %51 = dma.hbm_to_vmem [thread:$0]  %s44_s7, 2048, %s46_s8, [#allocation6], %s555_s26, %s555_s26, %s556_s27  }
   0xb   :  { %548 = dma.done.wait [#allocation3], 1024  }
   0xc   :  { %549 = vsyncadd [#allocation3], 4294966272 }
   0xd   :  { %550 = dma.done.wait [#allocation6], 18432  }
   0xe   :  { %551 = vsyncadd [#allocation6], 4294948864  ;;  %v96_v0 = vld [vmem:[#allocation5 + $0x70] sm:$0xff]  ;;  %v97_v1 = vld [vmem:[#allocation5 + $0x78] sm:$0xff]  ;;  %s559_s10 = smov [#allocation8]   ;;  %s433_s14 = sshll.u32 %s613_s5, 4  ;;  %s434_s14 = int_to_ptr.hbm [resolvable:$true] %s433_s14 }
   0xf   :  { %v112_v2 = vld [vmem:[#allocation5 + $0xf0] sm:$0xff]  ;;  %v217_v3 = vpack.c.bf16 %v97_v1, %v96_v0  ;;  %v113_v4 = vld [vmem:[#allocation5 + $0xf8] sm:$0xff]  ;;  %v94_v11 = vld [vmem:[#allocation5 + $0x60] sm:$0xff]  ;;  %s431_s11 = sshll.u32 %s559_s10, 4  ;;  %s432_s11 = int_to_ptr.vmem [resolvable:$true] %s431_s11 }
  0x10   :  { %v128_v5 = vld [vmem:[#allocation5 + $0x170] sm:$0xff]  ;;  %v129_v6 = vld [vmem:[#allocation5 + $0x178] sm:$0xff]  ;;  %v225_v7 = vpack.c.bf16 %v113_v4, %v112_v2  ;;  %v95_v13 = vld [vmem:[#allocation5 + $0x68] sm:$0xff] }
  0x11   :  { %v233_v8 = vpack.c.bf16 %v129_v6, %v128_v5  ;;  %v144_v9 = vld [vmem:[#allocation5 + $0x1f0] sm:$0xff]  ;;  %v145_v10 = vld [vmem:[#allocation5 + $0x1f8] sm:$0xff]  ;;  %278 = vmatpush.bf16.msra.mxu0 %v217_v3  ;;  %v110_v14 = vld [vmem:[#allocation5 + $0xe0] sm:$0xff]  ;;  %v216_v16 = vpack.c.bf16 %v95_v13, %v94_v11 }
  0x12   :  { %v241_v12 = vpack.c.bf16 %v145_v10, %v144_v9  ;;  %v111_v15 = vld [vmem:[#allocation5 + $0xe8] sm:$0xff]  ;;  %291 = vmatpush.bf16.msra.mxu1 %v225_v7  ;;  %v126_v18 = vld [vmem:[#allocation5 + $0x160] sm:$0xff]  ;;  %v92_v23 = vld [vmem:[#allocation5 + $0x50] sm:$0xff] }
  0x13   :  { %304 = vmatpush.bf16.msra.mxu2 %v233_v8  ;;  %v224_v17 = vpack.c.bf16 %v111_v15, %v110_v14  ;;  %v127_v19 = vld [vmem:[#allocation5 + $0x168] sm:$0xff]  ;;  %v142_v20 = vld [vmem:[#allocation5 + $0x1e0] sm:$0xff]  ;;  %v93_v24 = vld [vmem:[#allocation5 + $0x58] sm:$0xff] }
  0x14   :  { %317 = vmatpush.bf16.msra.mxu3 %v241_v12  ;;  %v232_v21 = vpack.c.bf16 %v127_v19, %v126_v18  ;;  %v143_v22 = vld [vmem:[#allocation5 + $0x1e8] sm:$0xff]  ;;  %v108_v26 = vld [vmem:[#allocation5 + $0xd0] sm:$0xff]  ;;  %v109_v27 = vld [vmem:[#allocation5 + $0xd8] sm:$0xff]  ;;  %v215_v29 = vpack.c.bf16 %v93_v24, %v92_v23 }
  0x15   :  { %v240_v25 = vpack.c.bf16 %v143_v22, %v142_v20  ;;  %v124_v28 = vld [vmem:[#allocation5 + $0x150] sm:$0xff]  ;;  %279 = vmatpush.bf16.msra.mxu0 %v216_v16  ;;  %v125_v30 = vld [vmem:[#allocation5 + $0x158] sm:$0xff]  ;;  %v223_v33 = vpack.c.bf16 %v109_v27, %v108_v26  ;;  %v90_v35 = vld [vmem:[#allocation5 + $0x40] sm:$0xff] }
  0x16   :  { %v140_v31 = vld [vmem:[#allocation5 + $0x1d0] sm:$0xff]  ;;  %v141_v32 = vld [vmem:[#allocation5 + $0x1d8] sm:$0xff]  ;;  %292 = vmatpush.bf16.msra.mxu1 %v224_v17  ;;  %v231_v34 = vpack.c.bf16 %v125_v30, %v124_v28  ;;  %v91_v36 = vld [vmem:[#allocation5 + $0x48] sm:$0xff] }
  0x17   :  { %305 = vmatpush.bf16.msra.mxu2 %v232_v21  ;;  %v106_v37 = vld [vmem:[#allocation5 + $0xc0] sm:$0xff]  ;;  %v239_v38 = vpack.c.bf16 %v141_v32, %v140_v31  ;;  %v107_v39 = vld [vmem:[#allocation5 + $0xc8] sm:$0xff]  ;;  %v214_v44 = vpack.c.bf16 %v91_v36, %v90_v35  ;;  %v88_v47 = vld [vmem:[#allocation5 + $0x30] sm:$0xff] }
  0x18   :  { %318 = vmatpush.bf16.msra.mxu3 %v240_v25  ;;  %v122_v40 = vld [vmem:[#allocation5 + $0x140] sm:$0xff]  ;;  %v123_v41 = vld [vmem:[#allocation5 + $0x148] sm:$0xff]  ;;  %v222_v45 = vpack.c.bf16 %v107_v39, %v106_v37  ;;  %v89_v48 = vld [vmem:[#allocation5 + $0x38] sm:$0xff] }
  0x19   :  { %v138_v42 = vld [vmem:[#allocation5 + $0x1c0] sm:$0xff]  ;;  %v139_v43 = vld [vmem:[#allocation5 + $0x1c8] sm:$0xff]  ;;  %280 = vmatpush.bf16.msra.mxu0 %v215_v29  ;;  %v230_v46 = vpack.c.bf16 %v123_v41, %v122_v40  ;;  %v104_v49 = vld [vmem:[#allocation5 + $0xb0] sm:$0xff]  ;;  %v213_v56 = vpack.c.bf16 %v89_v48, %v88_v47 }
  0x1a   :  { %293 = vmatpush.bf16.msra.mxu1 %v223_v33  ;;  %v238_v50 = vpack.c.bf16 %v139_v43, %v138_v42  ;;  %v105_v51 = vld [vmem:[#allocation5 + $0xb8] sm:$0xff]  ;;  %v120_v52 = vld [vmem:[#allocation5 + $0x130] sm:$0xff]  ;;  %v86_v59 = vld [vmem:[#allocation5 + $0x20] sm:$0xff] }
  0x1b   :  { %306 = vmatpush.bf16.msra.mxu2 %v231_v34  ;;  %v121_v53 = vld [vmem:[#allocation5 + $0x138] sm:$0xff]  ;;  %v136_v54 = vld [vmem:[#allocation5 + $0x1b0] sm:$0xff]  ;;  %v221_v57 = vpack.c.bf16 %v105_v51, %v104_v49  ;;  %v87_v60 = vld [vmem:[#allocation5 + $0x28] sm:$0xff] }
  0x1c   :  { %319 = vmatpush.bf16.msra.mxu3 %v239_v38  ;;  %v137_v55 = vld [vmem:[#allocation5 + $0x1b8] sm:$0xff]  ;;  %v229_v58 = vpack.c.bf16 %v121_v53, %v120_v52  ;;  %v102_v61 = vld [vmem:[#allocation5 + $0xa0] sm:$0xff]  ;;  %v103_v63 = vld [vmem:[#allocation5 + $0xa8] sm:$0xff]  ;;  %v212_v4 = vpack.c.bf16 %v87_v60, %v86_v59 }
  0x1d   :  { %281 = vmatpush.bf16.msra.mxu0 %v214_v44  ;;  %v237_v62 = vpack.c.bf16 %v137_v55, %v136_v54  ;;  %v118_v0 = vld [vmem:[#allocation5 + $0x120] sm:$0xff]  ;;  %v119_v1 = vld [vmem:[#allocation5 + $0x128] sm:$0xff]  ;;  %v220_v5 = vpack.c.bf16 %v103_v63, %v102_v61  ;;  %v84_v7 = vld [vmem:[#allocation5 + $0x10] sm:$0xff] }
  0x1e   :  { %294 = vmatpush.bf16.msra.mxu1 %v222_v45  ;;  %v134_v2 = vld [vmem:[#allocation5 + $0x1a0] sm:$0xff]  ;;  %v135_v3 = vld [vmem:[#allocation5 + $0x1a8] sm:$0xff]  ;;  %v228_v6 = vpack.c.bf16 %v119_v1, %v118_v0  ;;  %v85_v8 = vld [vmem:[#allocation5 + $0x18] sm:$0xff] }
  0x1f   :  { %307 = vmatpush.bf16.msra.mxu2 %v230_v46  ;;  %v100_v9 = vld [vmem:[#allocation5 + $0x90] sm:$0xff]  ;;  %v236_v10 = vpack.c.bf16 %v135_v3, %v134_v2  ;;  %v101_v11 = vld [vmem:[#allocation5 + $0x98] sm:$0xff]  ;;  %v211_v16 = vpack.c.bf16 %v85_v8, %v84_v7  ;;  %v82_v17 = vld [vmem:[#allocation5] sm:$0xff] }
  0x20   :  { %320 = vmatpush.bf16.msra.mxu3 %v238_v50  ;;  %v116_v12 = vld [vmem:[#allocation5 + $0x110] sm:$0xff]  ;;  %v117_v13 = vld [vmem:[#allocation5 + $0x118] sm:$0xff]  ;;  %v83_v18 = vld [vmem:[#allocation5 + $0x8] sm:$0xff]  ;;  %v219_v19 = vpack.c.bf16 %v101_v11, %v100_v9 }
  0x21   :  { %282 = vmatpush.bf16.msra.mxu0 %v213_v56  ;;  %v132_v14 = vld [vmem:[#allocation5 + $0x190] sm:$0xff]  ;;  %v133_v15 = vld [vmem:[#allocation5 + $0x198] sm:$0xff]  ;;  %v227_v20 = vpack.c.bf16 %v117_v13, %v116_v12  ;;  %v98_v21 = vld [vmem:[#allocation5 + $0x80] sm:$0xff]  ;;  %v210_v31 = vpack.c.bf16 %v83_v18, %v82_v17 }
  0x22   :  { %295 = vmatpush.bf16.msra.mxu1 %v221_v57  ;;  %v99_v22 = vld [vmem:[#allocation5 + $0x88] sm:$0xff]  ;;  %v114_v23 = vld [vmem:[#allocation5 + $0x100] sm:$0xff]  ;;  %v235_v24 = vpack.c.bf16 %v133_v15, %v132_v14  ;;  %v160_v28 = vld [vmem:[#allocation5 + $0x270] sm:$0xff] }
  0x23   :  { %308 = vmatpush.bf16.msra.mxu2 %v229_v58  ;;  %v115_v25 = vld [vmem:[#allocation5 + $0x108] sm:$0xff]  ;;  %v130_v26 = vld [vmem:[#allocation5 + $0x180] sm:$0xff]  ;;  %v161_v29 = vld [vmem:[#allocation5 + $0x278] sm:$0xff]  ;;  %v218_v35 = vpack.c.bf16 %v99_v22, %v98_v21 }
  0x24   :  { %321 = vmatpush.bf16.msra.mxu3 %v237_v62  ;;  %v131_v27 = vld [vmem:[#allocation5 + $0x188] sm:$0xff]  ;;  %v176_v30 = vld [vmem:[#allocation5 + $0x2f0] sm:$0xff]  ;;  %v177_v32 = vld [vmem:[#allocation5 + $0x2f8] sm:$0xff]  ;;  %v226_v36 = vpack.c.bf16 %v115_v25, %v114_v23  ;;  %v249_v41 = vpack.c.bf16 %v161_v29, %v160_v28 }
  0x25   :  { %283 = vmatpush.bf16.msra.mxu0 %v212_v4  ;;  %v192_v33 = vld [vmem:[#allocation5 + $0x370] sm:$0xff]  ;;  %v193_v34 = vld [vmem:[#allocation5 + $0x378] sm:$0xff]  ;;  %v234_v40 = vpack.c.bf16 %v131_v27, %v130_v26  ;;  %v158_v42 = vld [vmem:[#allocation5 + $0x260] sm:$0xff]  ;;  %v257_v45 = vpack.c.bf16 %v177_v32, %v176_v30 }
  0x26   :  { %296 = vmatpush.bf16.msra.mxu1 %v220_v5  ;;  %v208_v37 = vld [vmem:[#allocation5 + $0x3f0] sm:$0xff]  ;;  %v209_v38 = vld [vmem:[#allocation5 + $0x3f8] sm:$0xff]  ;;  %v159_v43 = vld [vmem:[#allocation5 + $0x268] sm:$0xff]  ;;  %v265_v46 = vpack.c.bf16 %v193_v34, %v192_v33 }
  0x27   :  { %309 = vmatpush.bf16.msra.mxu2 %v228_v6  ;;  %v68_v39 = vld [vmem:[#allocation2 + $0x10] sm:$0xff]  ;;  %v66_v44 = vld [vmem:[#allocation2] sm:$0xff]  ;;  %v69_v48 = vld [vmem:[#allocation2 + $0x18] sm:$0xff]  ;;  %v273_v50 = vpack.c.bf16 %v209_v38, %v208_v37  ;;  %v248_v59 = vpack.c.bf16 %v159_v43, %v158_v42 }
  0x28   :  { %322 = vmatpush.bf16.msra.mxu3 %v236_v10  ;;  %v174_v47 = vld [vmem:[#allocation5 + $0x2e0] sm:$0xff]  ;;  %v67_v49 = vld [vmem:[#allocation2 + $0x8] sm:$0xff]  ;;  %v76_v54 = vpack.c.bf16 %v68_v39, %v68_v39  ;;  %v74_v57 = vpack.c.bf16 %v66_v44, %v66_v44  ;;  %v77_v58 = vpack.c.bf16 %v69_v48, %v69_v48  ;;  %v156_v63 = vld [vmem:[#allocation5 + $0x250] sm:$0xff] }
  0x29   :  { %284 = vmatpush.bf16.msra.mxu0 %v211_v16  ;;  %v175_v51 = vld [vmem:[#allocation5 + $0x2e8] sm:$0xff]  ;;  %v190_v52 = vld [vmem:[#allocation5 + $0x360] sm:$0xff]  ;;  %v75_v60 = vpack.c.bf16 %v67_v49, %v67_v49  ;;  %v157_v0 = vld [vmem:[#allocation5 + $0x258] sm:$0xff] }
  0x2a   :  { %297 = vmatpush.bf16.msra.mxu1 %v219_v19  ;;  %v191_v53 = vld [vmem:[#allocation5 + $0x368] sm:$0xff]  ;;  %v206_v55 = vld [vmem:[#allocation5 + $0x3e0] sm:$0xff]  ;;  %v256_v61 = vpack.c.bf16 %v175_v51, %v174_v47  ;;  %v172_v1 = vld [vmem:[#allocation5 + $0x2d0] sm:$0xff]  ;;  %v247_v8 = vpack.c.bf16 %v157_v0, %v156_v63 }
  0x2b   :  { %310 = vmatpush.bf16.msra.mxu2 %v227_v20  ;;  %v207_v56 = vld [vmem:[#allocation5 + $0x3e8] sm:$0xff]  ;;  %v264_v62 = vpack.c.bf16 %v191_v53, %v190_v52  ;;  %v173_v3 = vld [vmem:[#allocation5 + $0x2d8] sm:$0xff]  ;;  %v188_v4 = vld [vmem:[#allocation5 + $0x350] sm:$0xff] }
  0x2c   :  { %323 = vmatpush.bf16.msra.mxu3 %v235_v24  ;;  %v272_v2 = vpack.c.bf16 %v207_v56, %v206_v55  ;;  %v189_v5 = vld [vmem:[#allocation5 + $0x358] sm:$0xff]  ;;  %v204_v6 = vld [vmem:[#allocation5 + $0x3d0] sm:$0xff]  ;;  %v255_v9 = vpack.c.bf16 %v173_v3, %v172_v1  ;;  %v154_v11 = vld [vmem:[#allocation5 + $0x240] sm:$0xff] }
  0x2d   :  { %285 = vmatpush.bf16.msra.mxu0 %v210_v31  ;;  %v205_v7 = vld [vmem:[#allocation5 + $0x3d8] sm:$0xff]  ;;  %v263_v10 = vpack.c.bf16 %v189_v5, %v188_v4  ;;  %v155_v12 = vld [vmem:[#allocation5 + $0x248] sm:$0xff]  ;;  %v170_v13 = vld [vmem:[#allocation5 + $0x2c0] sm:$0xff] }
  0x2e   :  { %298 = vmatpush.bf16.msra.mxu1 %v218_v35  ;;  %v271_v14 = vpack.c.bf16 %v205_v7, %v204_v6  ;;  %v171_v15 = vld [vmem:[#allocation5 + $0x2c8] sm:$0xff]  ;;  %v186_v16 = vld [vmem:[#allocation5 + $0x340] sm:$0xff]  ;;  %v246_v20 = vpack.c.bf16 %v155_v12, %v154_v11  ;;  %v152_v23 = vld [vmem:[#allocation5 + $0x230] sm:$0xff] }
  0x2f   :  { %311 = vmatpush.bf16.msra.mxu2 %v226_v36  ;;  %v187_v17 = vld [vmem:[#allocation5 + $0x348] sm:$0xff]  ;;  %v202_v18 = vld [vmem:[#allocation5 + $0x3c0] sm:$0xff]  ;;  %v254_v21 = vpack.c.bf16 %v171_v15, %v170_v13  ;;  %v153_v24 = vld [vmem:[#allocation5 + $0x238] sm:$0xff] }
  0x30   :  { %324 = vmatpush.bf16.msra.mxu3 %v234_v40  ;;  %286 = vmatmul.bf16.vlgmr.msra.gmra.mxu0 %v74_v57  ;;  %v203_v19 = vld [vmem:[#allocation5 + $0x3c8] sm:$0xff]  ;;  %v262_v22 = vpack.c.bf16 %v187_v17, %v186_v16  ;;  %v168_v25 = vld [vmem:[#allocation5 + $0x2b0] sm:$0xff]  ;;  %v169_v27 = vld [vmem:[#allocation5 + $0x2b8] sm:$0xff]  ;;  %v245_v32 = vpack.c.bf16 %v153_v24, %v152_v23 }
  0x31   :  { %330 = vmatpush.bf16.msrb.mxu0 %v249_v41  ;;  %299 = vmatmul.bf16.vlgmr.msra.gmra.mxu1 %v75_v60  ;;  %v270_v26 = vpack.c.bf16 %v203_v19, %v202_v18  ;;  %v184_v28 = vld [vmem:[#allocation5 + $0x330] sm:$0xff]  ;;  %v185_v29 = vld [vmem:[#allocation5 + $0x338] sm:$0xff]  ;;  %v150_v33 = vld [vmem:[#allocation5 + $0x220] sm:$0xff]  ;;  %v253_v34 = vpack.c.bf16 %v169_v27, %v168_v25 }
  0x32   :  { %343 = vmatpush.bf16.msrb.mxu1 %v257_v45  ;;  %312 = vmatmul.bf16.vlgmr.msra.gmra.mxu2 %v76_v54  ;;  %v200_v30 = vld [vmem:[#allocation5 + $0x3b0] sm:$0xff]  ;;  %v201_v31 = vld [vmem:[#allocation5 + $0x3b8] sm:$0xff]  ;;  %v261_v35 = vpack.c.bf16 %v185_v29, %v184_v28  ;;  %v151_v36 = vld [vmem:[#allocation5 + $0x228] sm:$0xff] }
  0x33   :  { %356 = vmatpush.bf16.msrb.mxu2 %v265_v46  ;;  %325 = vmatmul.bf16.vlgmr.msra.gmra.mxu3 %v77_v58  ;;  %v166_v37 = vld [vmem:[#allocation5 + $0x2a0] sm:$0xff]  ;;  %v269_v38 = vpack.c.bf16 %v201_v31, %v200_v30  ;;  %v167_v39 = vld [vmem:[#allocation5 + $0x2a8] sm:$0xff]  ;;  %v244_v44 = vpack.c.bf16 %v151_v36, %v150_v33  ;;  %v148_v47 = vld [vmem:[#allocation5 + $0x210] sm:$0xff] }
  0x34   :  { %369 = vmatpush.bf16.msrb.mxu3 %v273_v50  ;;  %v182_v40 = vld [vmem:[#allocation5 + $0x320] sm:$0xff]  ;;  %v183_v41 = vld [vmem:[#allocation5 + $0x328] sm:$0xff]  ;;  %v252_v45 = vpack.c.bf16 %v167_v39, %v166_v37  ;;  %v149_v48 = vld [vmem:[#allocation5 + $0x218] sm:$0xff] }
  0x35   :  { %331 = vmatpush.bf16.msrb.mxu0 %v248_v59  ;;  %v198_v42 = vld [vmem:[#allocation5 + $0x3a0] sm:$0xff]  ;;  %v199_v43 = vld [vmem:[#allocation5 + $0x3a8] sm:$0xff]  ;;  %v260_v46 = vpack.c.bf16 %v183_v41, %v182_v40  ;;  %v164_v49 = vld [vmem:[#allocation5 + $0x290] sm:$0xff]  ;;  %v243_v56 = vpack.c.bf16 %v149_v48, %v148_v47 }
  0x36   :  { %344 = vmatpush.bf16.msrb.mxu1 %v256_v61  ;;  %v268_v50 = vpack.c.bf16 %v199_v43, %v198_v42  ;;  %v165_v51 = vld [vmem:[#allocation5 + $0x298] sm:$0xff]  ;;  %v180_v52 = vld [vmem:[#allocation5 + $0x310] sm:$0xff]  ;;  %v146_v59 = vld [vmem:[#allocation5 + $0x200] sm:$0xff] }
  0x37   :  { %357 = vmatpush.bf16.msrb.mxu2 %v264_v62  ;;  %v181_v53 = vld [vmem:[#allocation5 + $0x318] sm:$0xff]  ;;  %v196_v54 = vld [vmem:[#allocation5 + $0x390] sm:$0xff]  ;;  %v251_v57 = vpack.c.bf16 %v165_v51, %v164_v49  ;;  %v147_v60 = vld [vmem:[#allocation5 + $0x208] sm:$0xff] }
  0x38   :  { %370 = vmatpush.bf16.msrb.mxu3 %v272_v2  ;;  %v197_v55 = vld [vmem:[#allocation5 + $0x398] sm:$0xff]  ;;  %v259_v58 = vpack.c.bf16 %v181_v53, %v180_v52  ;;  %v162_v61 = vld [vmem:[#allocation5 + $0x280] sm:$0xff]  ;;  %v163_v63 = vld [vmem:[#allocation5 + $0x288] sm:$0xff]  ;;  %v242_v4 = vpack.c.bf16 %v147_v60, %v146_v59 }
  0x39   :  { %332 = vmatpush.bf16.msrb.mxu0 %v247_v8  ;;  %v267_v62 = vpack.c.bf16 %v197_v55, %v196_v54  ;;  %v178_v0 = vld [vmem:[#allocation5 + $0x300] sm:$0xff]  ;;  %v179_v1 = vld [vmem:[#allocation5 + $0x308] sm:$0xff]  ;;  %v250_v6 = vpack.c.bf16 %v163_v63, %v162_v61  ;;  %v73_v11 = vld [vmem:[#allocation2 + $0x38] sm:$0xff] }
  0x3a   :  { %345 = vmatpush.bf16.msrb.mxu1 %v255_v9  ;;  %v194_v2 = vld [vmem:[#allocation5 + $0x380] sm:$0xff]  ;;  %v195_v3 = vld [vmem:[#allocation5 + $0x388] sm:$0xff]  ;;  %v258_v7 = vpack.c.bf16 %v179_v1, %v178_v0  ;;  %v72_v9 = vld [vmem:[#allocation2 + $0x30] sm:$0xff]  ;;  %v81_v15 = vpack.c.bf16 %v73_v11, %v73_v11 }
  0x3b   :  { %358 = vmatpush.bf16.msrb.mxu2 %v263_v10  ;;  %v70_v5 = vld [vmem:[#allocation2 + $0x20] sm:$0xff]  ;;  %v71_v8 = vld [vmem:[#allocation2 + $0x28] sm:$0xff]  ;;  %v266_v10 = vpack.c.bf16 %v195_v3, %v194_v2  ;;  %v397_v16 = vld [vmem:[#allocation7 + $0x70] sm:$0xff] }
  0x3c   :  { %371 = vmatpush.bf16.msrb.mxu3 %v271_v14  ;;  %v78_v12 = vpack.c.bf16 %v70_v5, %v70_v5  ;;  %v79_v13 = vpack.c.bf16 %v71_v8, %v71_v8  ;;  %v80_v14 = vpack.c.bf16 %v72_v9, %v72_v9  ;;  %v398_v17 = vld [vmem:[#allocation7 + $0x78] sm:$0xff]  ;;  %v395_v19 = vld [vmem:[#allocation7 + $0x60] sm:$0xff]  ;;  %v389_v28 = vld [vmem:[#allocation7 + $0x30] sm:$0xff] }
  0x3d   :  { %333 = vmatpush.bf16.msrb.mxu0 %v246_v20  ;;  %v406_v18 = vpack.c.bf16 %v398_v17, %v397_v16  ;;  %v396_v20 = vld [vmem:[#allocation7 + $0x68] sm:$0xff]  ;;  %v394_v23 = vld [vmem:[#allocation7 + $0x58] sm:$0xff]  ;;  %v391_v25 = vld [vmem:[#allocation7 + $0x40] sm:$0xff] }
  0x3e   :  { %346 = vmatpush.bf16.msrb.mxu1 %v254_v21  ;;  %v405_v21 = vpack.c.bf16 %v396_v20, %v395_v19  ;;  %v390_v29 = vld [vmem:[#allocation7 + $0x38] sm:$0xff]  ;;  %v387_v31 = vld [vmem:[#allocation7 + $0x20] sm:$0xff]  ;;  %v385_v36 = vld [vmem:[#allocation7 + $0x10] sm:$0xff] }
  0x3f   :  { %359 = vmatpush.bf16.msrb.mxu2 %v262_v22  ;;  %v393_v22 = vld [vmem:[#allocation7 + $0x50] sm:$0xff]  ;;  %v402_v30 = vpack.c.bf16 %v390_v29, %v389_v28  ;;  %v386_v37 = vld [vmem:[#allocation7 + $0x18] sm:$0xff]  ;;  %v383_v41 = vld [vmem:[#allocation7] sm:$0xff] }
  0x40   :  { %372 = vmatpush.bf16.msrb.mxu3 %v270_v26  ;;  %v404_v24 = vpack.c.bf16 %v394_v23, %v393_v22  ;;  %v392_v26 = vld [vmem:[#allocation7 + $0x48] sm:$0xff]  ;;  %v451_v3 = vld [vmem:[%s612_s4] ss:$0 sm:$0xff] }
  0x41   :  { %334 = vmatpush.bf16.msrb.mxu0 %v245_v32  ;;  %v403_v27 = vpack.c.bf16 %v392_v26, %v391_v25  ;;  %v388_v32 = vld [vmem:[#allocation7 + $0x28] sm:$0xff] }
  0x42   :  { %347 = vmatpush.bf16.msrb.mxu1 %v253_v34  ;;  %v401_v34 = vpack.c.bf16 %v388_v32, %v387_v31  ;;  %v384_v42 = vld [vmem:[#allocation7 + $0x8] sm:$0xff] }
  0x43   :  { %360 = vmatpush.bf16.msrb.mxu2 %v261_v35 }
  0x44   :  { %373 = vmatpush.bf16.msrb.mxu3 %v269_v38  ;;  %v400_v38 = vpack.c.bf16 %v386_v37, %v385_v36 }
  0x45   :  { %335 = vmatpush.bf16.msrb.mxu0 %v244_v44  ;;  %v399_v44 = vpack.c.bf16 %v384_v42, %v383_v41 }
  0x46   :  { %348 = vmatpush.bf16.msrb.mxu1 %v252_v45 }
  0x47   :  { %361 = vmatpush.bf16.msrb.mxu2 %v260_v46  ;;  %v450_v46 = vld [vmem:[%s610_s2] ss:$0 sm:$0xff] }
  0x48   :  { %374 = vmatpush.bf16.msrb.mxu3 %v268_v50 }
  0x49   :  { %336 = vmatpush.bf16.msrb.mxu0 %v243_v56 }
  0x4a   :  { %349 = vmatpush.bf16.msrb.mxu1 %v251_v57 }
  0x4b   :  { %362 = vmatpush.bf16.msrb.mxu2 %v259_v58 }
  0x4c   :  { %375 = vmatpush.bf16.msrb.mxu3 %v267_v62 }
  0x4d   :  { %337 = vmatpush.bf16.msrb.mxu0 %v242_v4 }
  0x4e   :  { %350 = vmatpush.bf16.msrb.mxu1 %v250_v6 }
  0x4f   :  { %363 = vmatpush.bf16.msrb.mxu2 %v258_v7 }
  0x50   :  { %376 = vmatpush.bf16.msrb.mxu3 %v266_v10  ;;  %338 = vmatmul.bf16.vlgmr.msrb.gmra.mxu0 %v78_v12 }
  0x51   :  { %351 = vmatmul.bf16.vlgmr.msrb.gmra.mxu1 %v79_v13  ;;  %412 = vmatpush.bf16.msra.mxu0 %v406_v18 }
  0x52   :  { %364 = vmatmul.bf16.vlgmr.msrb.gmra.mxu2 %v80_v14 }
  0x53   :  { %377 = vmatmul.bf16.vlgmr.msrb.gmra.mxu3 %v81_v15 }
  0x55   :  { %413 = vmatpush.bf16.msra.mxu0 %v405_v21 }
  0x59   :  { %414 = vmatpush.bf16.msra.mxu0 %v404_v24 }
  0x5d   :  { %415 = vmatpush.bf16.msra.mxu0 %v403_v27 }
  0x61   :  { %416 = vmatpush.bf16.msra.mxu0 %v402_v30 }
  0x65   :  { %417 = vmatpush.bf16.msra.mxu0 %v401_v34 }
  0x69   :  { %418 = vmatpush.bf16.msra.mxu0 %v400_v38 }
  0x6d   :  { %419 = vmatpush.bf16.msra.mxu0 %v399_v44 }
  0xad   :  { %v287_v33 = vpop.f32.mrf.mxu0 }
  0xae   :  { %v300_v35 = vpop.f32.mrf.mxu1  ;;  %v288_v49 = vadd.f32 %v450_v46, %v287_v33 }
  0xb0   :  { %v301_v50 = vadd.f32 %v300_v35, %v288_v49 }
  0xb5   :  { %v313_v39 = vpop.f32.mrf.mxu2  ;;  %v289_v43 = vpop.f32.mrf.mxu0 }
  0xb6   :  { %v326_v40 = vpop.f32.mrf.mxu3  ;;  %v302_v45 = vpop.f32.mrf.mxu1  ;;  %v314_v51 = vadd.f32 %v313_v39, %v301_v50 }
  0xb8   :  { %v327_v52 = vadd.f32 %v326_v40, %v314_v51 }
  0xbd   :  { %v315_v47 = vpop.f32.mrf.mxu2 }
  0xbe   :  { %v328_v48 = vpop.f32.mrf.mxu3 }
  0xcd   :  { %v339_v53 = vpop.f32.mrf.mxu0 }
  0xce   :  { %v352_v54 = vpop.f32.mrf.mxu1  ;;  %v340_v55 = vadd.f32 %v339_v53, %v327_v52 }
  0xd0   :  { %v353_v56 = vadd.f32 %v352_v54, %v340_v55 }
  0xd5   :  { %v365_v57 = vpop.f32.mrf.mxu2  ;;  %v341_v60 = vpop.f32.mrf.mxu0 }
  0xd6   :  { %v366_v58 = vadd.f32 %v365_v57, %v353_v56  ;;  %v378_v59 = vpop.f32.mrf.mxu3  ;;  %v354_v61 = vpop.f32.mrf.mxu1 }
  0xd8   :  { %v379_v62 = vadd.f32 %v378_v59, %v366_v58 }
  0xda   :  { %v382_v63 = vmax.f32 %v379_v62, 0.0 }
  0xdc   :  { %v407_v0 = vpack.c.bf16 %v382_v63, %v382_v63 }
  0xdd   :  { %v367_v1 = vpop.f32.mrf.mxu2 }
  0xde   :  { %v380_v2 = vpop.f32.mrf.mxu3  ;;  %420 = vmatmul.bf16.vlgmr.msra.gmra.mxu0 %v407_v0 }
 0x15b   :  { %v421_v4 = vpop.f32.mrf.mxu0 }
 0x15c   :  { %v422_v5 = vadd.f32 %v451_v3, %v421_v4 }
 0x15e   :  { %425 = vst [vmem:[#allocation8] sm:$0xff] %v422_v5 }
 0x15f   :  { %436 = dma.vmem_to_hbm [thread:$0]  %s432_s11, 128, %s434_s14, [#allocation4]  }
 0x163   :  { %v423_v6 = vpop.f32.mrf.mxu0 }
 0x164   :  { %552 = dma.done.wait [#allocation4], 128  }
 0x165   :  { %553 = vsyncadd [#allocation4], 4294967168 }
 0x166   :  { %441 = vsyncpa [#allocation3], 1 }
 0x167   :  { %442 = vsyncpa [#allocation6], 1 }
 0x168   :  { %443 = vsyncpa [#allocation4], 1 }

</bundles_post_ra>
